<compile_context>
chip_gen: v5e
topology: v5e:2x2
jax: 0.10.0
libtpu: 0.0.40
codegen_flags: <defaults>
</compile_context>

<pallas_src>
import jax
import jax.numpy as jnp
from jax.experimental import pallas as pl
from jax.experimental.pallas import tpu as pltpu

EPS = 1e-5

# Conservative VMEM budget for tile sizing (fits the 16/32/32 MiB scoped
# defaults on v5e/v6e/v7x with headroom for params + pipeline bookkeeping).
_VMEM_TILE_BUDGET = 24 * 1024 * 1024


def _batchnorm_kernel(x_ref, x2_ref, w_ref, b_ref, y1_ref, y2_ref):
    # ---- custom SyncBatchNorm branch (affine) ----
    x = x_ref[...].astype(jnp.float32)                      # (N, TC)
    mean = jnp.mean(x, axis=0, keepdims=True)                # (1, TC)
    xc = x - mean                                            # reused below
    var = jnp.mean(xc * xc, axis=0, keepdims=True)           # biased variance
    scale = jax.lax.rsqrt(var + EPS) * w_ref[...]            # fold gamma (1, TC)
    y1_ref[...] = (xc * scale + b_ref[...]).astype(y1_ref.dtype)

    # ---- nn.BatchNorm1d branch (affine=False) ----
    x2 = x2_ref[...].astype(jnp.float32)
    m2 = jnp.mean(x2, axis=0, keepdims=True)
    xc2 = x2 - m2
    v2 = jnp.mean(xc2 * xc2, axis=0, keepdims=True)
    y2_ref[...] = (xc2 * jax.lax.rsqrt(v2 + EPS)).astype(y2_ref.dtype)


def _pick_feature_tile(n, c):
    """Largest 128-multiple divisor of C whose (N, TC) working set fits VMEM."""
    if c % 128 != 0:
        # Small / non-lane-aligned C: single full-array block (always legal).
        return c
    # Per feature column in VMEM: 4 f32 (N,*) arrays (x, x2, y1, y2), each
    # double-buffered by the pipeline.
    bytes_per_col = 4 * 4 * n * 2
    max_tc = max(128, (_VMEM_TILE_BUDGET // bytes_per_col) // 128 * 128)
    tc = min(c, max_tc)
    while c % tc != 0:  # keep TC an exact divisor of C (and a 128-multiple)
        tc -= 128
    return tc


def net_forward(x, x2, weight, bias):
    """Fused dual-batchnorm Pallas kernel.

    x, x2   : (N, DIM) float32
    weight  : (1, DIM) float32   (custom SyncBatchNorm gamma)
    bias    : (1, DIM) float32   (custom SyncBatchNorm beta)
    returns : (res_custom, res_torch), each (N, DIM) float32
    """
    n, c = x.shape
    assert x2.shape == (n, c)
    assert weight.shape == (1, c) and bias.shape == (1, c)

    tc = _pick_feature_tile(n, c)
    grid = (c // tc,)

    data_spec = pl.BlockSpec((n, tc), lambda j: (0, j))
    param_spec = pl.BlockSpec((1, tc), lambda j: (0, j))

    # Mem-bound: read x, x2; write y1, y2; plus params.  ~10 flops/elem, 2
    # rsqrt per feature column.
    cost = pl.CostEstimate(
        flops=10 * n * c,
        transcendentals=2 * c,
        bytes_accessed=16 * n * c + 8 * c,
    )

    return pl.pallas_call(
        _batchnorm_kernel,
        out_shape=(
            jax.ShapeDtypeStruct((n, c), x.dtype),
            jax.ShapeDtypeStruct((n, c), x2.dtype),
        ),
        grid=grid,
        in_specs=[data_spec, data_spec, param_spec, param_spec],
        out_specs=(data_spec, data_spec),
        compiler_params=pltpu.CompilerParams(
            dimension_semantics=("parallel",),  # v7x: shard tiles over 2 TCs
        ),
        cost_estimate=cost,
    )(x, x2, weight, bias)


def _reference(x, x2, weight, bias):
    mean = jnp.mean(x, axis=0, keepdims=True)
    var = jnp.mean((x - mean) ** 2, axis=0, keepdims=True)
    y1 = (x - mean) / jnp.sqrt(var + EPS) * weight + bias
    m2 = jnp.mean(x2, axis=0, keepdims=True)
    v2 = jnp.mean((x2 - m2) ** 2, axis=0, keepdims=True)
    y2 = (x2 - m2) / jnp.sqrt(v2 + EPS)
    return y1, y2


if __name__ == "__main__":
    DIM = 32   # feature dimension (DIM in the PyTorch module)
    N = 8      # batch size

    key = jax.random.PRNGKey(0)
    k1, k2 = jax.random.split(key)
    x = jax.random.normal(k1, (N, DIM), dtype=jnp.float32)
    x2 = jax.random.normal(k2, (N, DIM), dtype=jnp.float32)

    # Deterministic parameter init: SyncBatchNorm gamma=1, beta=0 (PyTorch default).
    weight = jnp.ones((1, DIM), dtype=jnp.float32)
    bias = jnp.zeros((1, DIM), dtype=jnp.float32)

    res_custom, res_torch = net_forward(x, x2, weight, bias)
    jax.block_until_ready((res_custom, res_torch))

    ref_custom, ref_torch = _reference(x, x2, weight, bias)
    assert jnp.allclose(res_custom, ref_custom, atol=1e-5, rtol=1e-5)
    assert jnp.allclose(res_torch, ref_torch, atol=1e-5, rtol=1e-5)

    print("KERNEL_OK")
</pallas_src>

<mosaic_0001>
module attributes {stable_mosaic.version = 11 : i64} {
  func.func @_batchnorm_kernel(%arg0: i32, %arg1: memref<8x32xf32, #tpu.memory_space<vmem>>, %arg2: memref<8x32xf32, #tpu.memory_space<vmem>>, %arg3: memref<1x32xf32, #tpu.memory_space<vmem>>, %arg4: memref<1x32xf32, #tpu.memory_space<vmem>>, %arg5: memref<8x32xf32, #tpu.memory_space<vmem>>, %arg6: memref<8x32xf32, #tpu.memory_space<vmem>>) attributes {dimension_semantics = [#tpu.dimension_semantics<parallel>], iteration_bounds = array<i64: 1>, scalar_prefetch = 0 : i64, scratch_operands = 0 : i64, tpu.core_type = #tpu.core_type<tc>, window_params = [{transform_indices = @transform_0, window_bounds = array<i64: 8, 32>}, {transform_indices = @transform_1, window_bounds = array<i64: 8, 32>}, {transform_indices = @transform_2, window_bounds = array<i64: 1, 32>}, {transform_indices = @transform_3, window_bounds = array<i64: 1, 32>}, {transform_indices = @transform_4, window_bounds = array<i64: 8, 32>}, {transform_indices = @transform_5, window_bounds = array<i64: 8, 32>}]} {
    %c0 = arith.constant 0 : index
    %c0_0 = arith.constant 0 : index
    %0 = vector.load %arg1[%c0, %c0_0] : memref<8x32xf32, #tpu.memory_space<vmem>>, vector<8x32xf32>
    %cst = arith.constant dense<0.000000e+00> : vector<32xf32>
    %1 = vector.multi_reduction <add>, %0, %cst [0] : vector<8x32xf32> to vector<32xf32>
    %2 = vector.shape_cast %1 : vector<32xf32> to vector<1x32xf32>
    %cst_1 = arith.constant 8.000000e+00 : f32
    %3 = vector.broadcast %cst_1 : f32 to vector<1x32xf32>
    %4 = arith.divf %2, %3 : vector<1x32xf32>
    %5 = vector.broadcast %4 : vector<1x32xf32> to vector<8x32xf32>
    %6 = arith.subf %0, %5 : vector<8x32xf32>
    %7 = arith.mulf %6, %6 : vector<8x32xf32>
    %cst_2 = arith.constant dense<0.000000e+00> : vector<32xf32>
    %8 = vector.multi_reduction <add>, %7, %cst_2 [0] : vector<8x32xf32> to vector<32xf32>
    %9 = vector.shape_cast %8 : vector<32xf32> to vector<1x32xf32>
    %cst_3 = arith.constant 8.000000e+00 : f32
    %10 = vector.broadcast %cst_3 : f32 to vector<1x32xf32>
    %11 = arith.divf %9, %10 : vector<1x32xf32>
    %cst_4 = arith.constant 9.99999974E-6 : f32
    %12 = vector.broadcast %cst_4 : f32 to vector<1x32xf32>
    %13 = arith.addf %11, %12 : vector<1x32xf32>
    %14 = math.rsqrt %13 : vector<1x32xf32>
    %c0_5 = arith.constant 0 : index
    %c0_6 = arith.constant 0 : index
    %15 = vector.load %arg3[%c0_5, %c0_6] : memref<1x32xf32, #tpu.memory_space<vmem>>, vector<1x32xf32>
    %16 = arith.mulf %14, %15 : vector<1x32xf32>
    %17 = vector.broadcast %16 : vector<1x32xf32> to vector<8x32xf32>
    %18 = arith.mulf %6, %17 : vector<8x32xf32>
    %c0_7 = arith.constant 0 : index
    %c0_8 = arith.constant 0 : index
    %19 = vector.load %arg4[%c0_7, %c0_8] : memref<1x32xf32, #tpu.memory_space<vmem>>, vector<1x32xf32>
    %20 = vector.broadcast %19 : vector<1x32xf32> to vector<8x32xf32>
    %21 = arith.addf %18, %20 : vector<8x32xf32>
    %c0_9 = arith.constant 0 : index
    %c0_10 = arith.constant 0 : index
    %22 = vector.load %arg5[%c0_9, %c0_10] : memref<8x32xf32, #tpu.memory_space<vmem>>, vector<8x32xf32>
    tpu.vector_store %arg5[%c0_9, %c0_10], %21 {strides = array<i32>} : memref<8x32xf32, #tpu.memory_space<vmem>>, vector<8x32xf32>,
    %c0_11 = arith.constant 0 : index
    %c0_12 = arith.constant 0 : index
    %23 = vector.load %arg2[%c0_11, %c0_12] : memref<8x32xf32, #tpu.memory_space<vmem>>, vector<8x32xf32>
    %cst_13 = arith.constant dense<0.000000e+00> : vector<32xf32>
    %24 = vector.multi_reduction <add>, %23, %cst_13 [0] : vector<8x32xf32> to vector<32xf32>
    %25 = vector.shape_cast %24 : vector<32xf32> to vector<1x32xf32>
    %cst_14 = arith.constant 8.000000e+00 : f32
    %26 = vector.broadcast %cst_14 : f32 to vector<1x32xf32>
    %27 = arith.divf %25, %26 : vector<1x32xf32>
    %28 = vector.broadcast %27 : vector<1x32xf32> to vector<8x32xf32>
    %29 = arith.subf %23, %28 : vector<8x32xf32>
    %30 = arith.mulf %29, %29 : vector<8x32xf32>
    %cst_15 = arith.constant dense<0.000000e+00> : vector<32xf32>
    %31 = vector.multi_reduction <add>, %30, %cst_15 [0] : vector<8x32xf32> to vector<32xf32>
    %32 = vector.shape_cast %31 : vector<32xf32> to vector<1x32xf32>
    %cst_16 = arith.constant 8.000000e+00 : f32
    %33 = vector.broadcast %cst_16 : f32 to vector<1x32xf32>
    %34 = arith.divf %32, %33 : vector<1x32xf32>
    %cst_17 = arith.constant 9.99999974E-6 : f32
    %35 = vector.broadcast %cst_17 : f32 to vector<1x32xf32>
    %36 = arith.addf %34, %35 : vector<1x32xf32>
    %37 = math.rsqrt %36 : vector<1x32xf32>
    %38 = vector.broadcast %37 : vector<1x32xf32> to vector<8x32xf32>
    %39 = arith.mulf %29, %38 : vector<8x32xf32>
    %c0_18 = arith.constant 0 : index
    %c0_19 = arith.constant 0 : index
    %40 = vector.load %arg6[%c0_18, %c0_19] : memref<8x32xf32, #tpu.memory_space<vmem>>, vector<8x32xf32>
    tpu.vector_store %arg6[%c0_18, %c0_19], %39 {strides = array<i32>} : memref<8x32xf32, #tpu.memory_space<vmem>>, vector<8x32xf32>,
    return
  }
  func.func @transform_0(%arg0: i32) -> (i32, i32) {
    %c0_i32 = arith.constant 0 : i32
    %c0_i32_0 = arith.constant 0 : i32
    return %c0_i32, %arg0 : i32, i32
  }
  func.func @transform_1(%arg0: i32) -> (i32, i32) {
    %c0_i32 = arith.constant 0 : i32
    %c0_i32_0 = arith.constant 0 : i32
    return %c0_i32, %arg0 : i32, i32
  }
  func.func @transform_2(%arg0: i32) -> (i32, i32) {
    %c0_i32 = arith.constant 0 : i32
    %c0_i32_0 = arith.constant 0 : i32
    return %c0_i32, %arg0 : i32, i32
  }
  func.func @transform_3(%arg0: i32) -> (i32, i32) {
    %c0_i32 = arith.constant 0 : i32
    %c0_i32_0 = arith.constant 0 : i32
    return %c0_i32, %arg0 : i32, i32
  }
  func.func @transform_4(%arg0: i32) -> (i32, i32) {
    %c0_i32 = arith.constant 0 : i32
    %c0_i32_0 = arith.constant 0 : i32
    return %c0_i32, %arg0 : i32, i32
  }
  func.func @transform_5(%arg0: i32) -> (i32, i32) {
    %c0_i32 = arith.constant 0 : i32
    %c0_i32_0 = arith.constant 0 : i32
    return %c0_i32, %arg0 : i32, i32
  }
}

</mosaic_0001>

<bundles_post_ra>
// kernel: tpu_custom_call.1
= control target key start
LH: loop header
LB: loop body
LE: loop exit
PB: predicated region body
PF: predicated region fallthrough
CT: control target
= control target key end

     0   :  { %11 = vsyncpa [#allocation3], 0  ;;  %s338_s0 = inlined_call_operand.hbm [shape: f32[8,32], index: 0, kind: input, shape index: {}]   ;;  %s339_s1 = inlined_call_operand.hbm [shape: f32[8,32], index: 1, kind: input, shape index: {}]   ;;  %s340_s2 = inlined_call_operand.vmem [shape: f32[1,32], index: 2, kind: input, shape index: {}]   ;;  %s341_s3 = inlined_call_operand.vmem [shape: f32[1,32], index: 3, kind: input, shape index: {}]   ;;  %s342_s4 = inlined_call_operand.hbm [shape: f32[8,32], index: 4, kind: output, shape index: {0}]   ;;  %s343_s5 = inlined_call_operand.hbm [shape: f32[8,32], index: 5, kind: output, shape index: {1}]  }
   0x1   :  { %12 = vsyncpa [#allocation6], 0 }
   0x2   :  { %13 = vsyncpa [#allocation4], 0 }
   0x3   :  { %14 = vsyncpa [#allocation9], 0  ;;  %s20_s20 = sshll.u32 %s338_s0, 4  ;;  %s279_s21 = smov [#allocation2]   ;;  %s21_s20 = int_to_ptr.hbm [resolvable:$true] %s20_s20 }
   0x4   :  { %s22_s22 = sshll.u32 %s279_s21, 4  ;;  %s31_s25 = sshll.u32 %s339_s1, 4  ;;  %s23_s22 = int_to_ptr.vmem [resolvable:$true] %s22_s22  ;;  %s32_s25 = int_to_ptr.hbm [resolvable:$true] %s31_s25 }
   0x5   :  { %25 = dma.hbm_to_vmem [thread:$0]  %s21_s20, 128, %s23_s22, [#allocation3]  }
   0x6   :  { %s280_s26 = smov [#allocation5]  }
   0x7   :  { %s33_s27 = sshll.u32 %s280_s26, 4  ;;  %s34_s27 = int_to_ptr.vmem [resolvable:$true] %s33_s27 }
   0x8   :  { %36 = dma.hbm_to_vmem [thread:$0]  %s32_s25, 128, %s34_s27, [#allocation6]  }
   0x9   :  { %271 = dma.done.wait [#allocation3], 128  }
   0xa   :  { %272 = vsyncadd [#allocation3], 4294967168 }
   0xb   :  { %273 = dma.done.wait [#allocation6], 128  }
   0xc   :  { %274 = vsyncadd [#allocation6], 4294967168  ;;  %v281_v0 = vmov 8.0   ;;  %vm50_vm0 = vcmask 261120   ;;  %v49_v2 = vld [vmem:[#allocation2] sm:$0xff]  ;;  %v97_v3 = vld [vmem:[#allocation5] sm:$0xff] }
   0xd   :  { %169 = vrcp.f32 %v281_v0  ;;  %v51_v4 = vsel %vm50_vm0, %v49_v2, 0.0  ;;  %v98_v6 = vsel %vm50_vm0, %v97_v3, 0.0  ;;  %v87_v58 = vld [vmem:[%s340_s2] sm:$0x1]  ;;  %s282_s28 = smov [#allocation8]   ;;  %s147_s7 = sshll.u32 %s343_s5, 4  ;;  %s148_s7 = int_to_ptr.hbm [resolvable:$true] %s147_s7 }
   0xe   :  { %v52_v7 = vrot.slane %v51_v4, 4  ;;  %v99_v8 = vrot.slane %v98_v6, 4  ;;  %s145_s29 = sshll.u32 %s282_s28, 4  ;;  %s283_s2 = smov [#allocation7]   ;;  %s146_s29 = int_to_ptr.vmem [resolvable:$true] %s145_s29 }
   0xf   :  { %s134_s10 = sshll.u32 %s283_s2, 4  ;;  %s136_s13 = sshll.u32 %s342_s4, 4  ;;  %s135_s10 = int_to_ptr.vmem [resolvable:$true] %s134_s10  ;;  %s137_s13 = int_to_ptr.hbm [resolvable:$true] %s136_s13 }
  0x10   :  { %v53_v10 = vadd.f32 %v52_v7, %v51_v4  ;;  %v100_v11 = vadd.f32 %v99_v8, %v98_v6 }
  0x12   :  { %v54_v13 = vrot.slane %v53_v10, 2  ;;  %v101_v14 = vrot.slane %v100_v11, 2 }
  0x13   :  { %v170_v1 = vpop.eup %169 }
  0x14   :  { %v59_v5 = vmul.f32 8.0, %v170_v1  ;;  %v55_v16 = vadd.f32 %v54_v13, %v53_v10  ;;  %vm63_vm1 = vweird.f32 %v170_v1  ;;  %v102_v17 = vadd.f32 %v101_v14, %v100_v11 }
  0x16   :  { %v60_v9 = vsub.f32 1.0, %v59_v5  ;;  %v56_v18 = vrot.slane %v55_v16, 1  ;;  %v103_v19 = vrot.slane %v102_v17, 1 }
  0x18   :  { %v61_v12 = vmul.f32 %v170_v1, %v60_v9  ;;  %v57_v21 = vadd.f32 %v56_v18, %v55_v16  ;;  %v104_v22 = vadd.f32 %v103_v19, %v102_v17 }
  0x1a   :  { %v62_v15 = vadd.f32 %v170_v1, %v61_v12 }
  0x1c   :  { %v64_v20 = vsel %vm63_vm1, %v170_v1, %v62_v15  ;;  %v168_v1 = vld [vmem:[%s341_s3] ss:$0 sm:$0xff] }
  0x1d   :  { %v65_v23 = vmul.f32 %v64_v20, %v57_v21  ;;  %v105_v24 = vmul.f32 %v104_v22, %v64_v20 }
  0x1f   :  { %v66_v25 = vsub.f32 %v49_v2, %v65_v23  ;;  %v106_v26 = vsub.f32 %v97_v3, %v105_v24 }
  0x21   :  { %v67_v27 = vmul.f32 %v66_v25, %v66_v25  ;;  %v107_v28 = vmul.f32 %v106_v26, %v106_v26 }
  0x23   :  { %v68_v29 = vsel %vm50_vm0, %v67_v27, 0.0  ;;  %v108_v30 = vsel %vm50_vm0, %v107_v28, 0.0 }
  0x24   :  { %v69_v31 = vrot.slane %v68_v29, 4  ;;  %v109_v32 = vrot.slane %v108_v30, 4 }
  0x26   :  { %v70_v33 = vadd.f32 %v69_v31, %v68_v29  ;;  %v110_v34 = vadd.f32 %v109_v32, %v108_v30 }
  0x28   :  { %v71_v35 = vrot.slane %v70_v33, 2  ;;  %v111_v36 = vrot.slane %v110_v34, 2 }
  0x2a   :  { %v72_v37 = vadd.f32 %v71_v35, %v70_v33  ;;  %v112_v38 = vadd.f32 %v111_v36, %v110_v34 }
  0x2c   :  { %v73_v39 = vrot.slane %v72_v37, 1  ;;  %v113_v40 = vrot.slane %v112_v38, 1 }
  0x2e   :  { %v74_v41 = vadd.f32 %v73_v39, %v72_v37  ;;  %v114_v42 = vadd.f32 %v113_v40, %v112_v38 }
  0x30   :  { %v75_v43 = vmul.f32 %v74_v41, %v64_v20  ;;  %v115_v44 = vmul.f32 %v114_v42, %v64_v20 }
  0x32   :  { %v76_v45 = vadd.f32 1e-05, %v75_v43  ;;  %v116_v46 = vadd.f32 1e-05, %v115_v44 }
  0x34   :  { %171 = vrsqrt.f32 %v76_v45  ;;  %vm83_vm2 = vweird.f32 %v76_v45  ;;  %vm123_vm4 = vweird.f32 %v116_v46 }
  0x35   :  { %173 = vrsqrt.f32 %v116_v46 }
  0x3a   :  { %v172_v47 = vpop.eup %171 }
  0x3b   :  { %v174_v48 = vpop.eup %173  ;;  %v78_v49 = vmul.f32 %v172_v47, %v76_v45  ;;  %vm84_vm3 = vweird.f32 %v172_v47 }
  0x3c   :  { %v118_v50 = vmul.f32 %v174_v48, %v116_v46  ;;  %vm124_vm5 = vweird.f32 %v174_v48  ;;  %vm85_vm6 = vmor %vm83_vm2, %vm84_vm3 }
  0x3d   :  { %v79_v51 = vmul.f32 %v172_v47, %v78_v49  ;;  %vm125_vm7 = vmor %vm123_vm4, %vm124_vm5 }
  0x3e   :  { %v119_v52 = vmul.f32 %v174_v48, %v118_v50 }
  0x3f   :  { %v80_v53 = vmul.f32 0.5, %v79_v51 }
  0x40   :  { %v120_v54 = vmul.f32 0.5, %v119_v52 }
  0x41   :  { %v81_v55 = vsub.f32 1.5, %v80_v53 }
  0x42   :  { %v121_v56 = vsub.f32 1.5, %v120_v54 }
  0x43   :  { %v82_v57 = vmul.f32 %v172_v47, %v81_v55 }
  0x44   :  { %v122_v59 = vmul.f32 %v174_v48, %v121_v56 }
  0x45   :  { %v86_v60 = vsel %vm85_vm6, %v172_v47, %v82_v57 }
  0x46   :  { %v88_v61 = vmul.f32 %v87_v58, %v86_v60  ;;  %v126_v62 = vsel %vm125_vm7, %v174_v48, %v122_v59 }
  0x47   :  { %v127_v63 = vmul.f32 %v126_v62, %v106_v26 }
  0x48   :  { %v89_v0 = vperm.slane %v88_v61, 0 }
  0x49   :  { %128 = vst.msk [vmem:[#allocation8] sm:$0xff] %vm50_vm0, %v127_v63 }
  0x4a   :  { %v90_v2 = vmul.f32 %v89_v0, %v66_v25  ;;  %150 = dma.vmem_to_hbm [thread:$0]  %s146_s29, 128, %s148_s7, [#allocation9]  }
  0x4c   :  { %v95_v3 = vadd.f32 %v168_v1, %v90_v2 }
  0x4e   :  { %96 = vst.msk [vmem:[#allocation7] sm:$0xff] %vm50_vm0, %v95_v3 }
  0x4f   :  { %139 = dma.vmem_to_hbm [thread:$0]  %s135_s10, 128, %s137_s13, [#allocation4]  }
  0x50   :  { %275 = dma.done.wait [#allocation4], 128  }
  0x51   :  { %276 = vsyncadd [#allocation4], 4294967168 }
  0x52   :  { %277 = dma.done.wait [#allocation9], 128  }
  0x53   :  { %278 = vsyncadd [#allocation9], 4294967168 }
  0x54   :  { %159 = vsyncpa [#allocation3], 1 }
  0x55   :  { %160 = vsyncpa [#allocation6], 1 }
  0x56   :  { %161 = vsyncpa [#allocation4], 1 }
  0x57   :  { %162 = vsyncpa [#allocation9], 1 }

</bundles_post_ra>
